<compile_context>
chip_gen: v5e
topology: v5e:2x2
jax: 0.10.0
libtpu: 0.0.40
codegen_flags: <defaults>
</compile_context>

<pallas_src>
import functools

import jax
import jax.numpy as jnp
from jax.experimental import pallas as pl
from jax.experimental.pallas import tpu as pltpu

LN_EPS = 1e-5
_MAX_POINT_BLOCK = 2048   # points per grid step (multiple of 8; ~2.5 MiB
                          # double-buffered at H=128/f32 -> fits every chip)


def _layer_norm(x, gamma, beta):
    u = jnp.mean(x, axis=-1, keepdims=True)
    d = x - u
    s = jnp.mean(d * d, axis=-1, keepdims=True)
    return gamma * (d * jax.lax.rsqrt(s + LN_EPS)) + beta


def _point_tile_kernel(x_ref, bias1_ref, bias2_ref,
                       stk2_ref, w1a_ref, w2a_ref, stkh_ref,
                       out_ref, *, mxu_dtype):
    # Stacked vector params: stk2 = [w0_row0, w0_row1, b0, g0, be0, g1, be1]
    stk2 = stk2_ref[...]                               # (7, H/2)
    w0r0, w0r1 = stk2[0:1, :], stk2[1:2, :]
    b0, g0, be0 = stk2[2:3, :], stk2[3:4, :], stk2[4:5, :]
    g1, be1 = stk2[5:6, :], stk2[6:7, :]
    stkh = stkh_ref[...]                               # (2, H) = [g2, be2]
    g2, be2 = stkh[0:1, :], stkh[1:2, :]

    # ---- layer 0: (pt, 2) contraction, K=2 -> keep it on the VPU ----
    x = x_ref[...]                                     # (pt, 2)
    h = x[:, 0:1] * w0r0 + x[:, 1:2] * w0r1 + b0       # (pt, H/2)
    h = jnp.maximum(_layer_norm(h, g0, be0), 0.0)

    # ---- layer 1: split matmul; agent-constant half folded into bias1 ----
    # bias1_ref is the per-agent (1, H/2) folded bias; sublane-broadcast is free.
    h = jnp.dot(h.astype(mxu_dtype), w1a_ref[...].astype(mxu_dtype),
                preferred_element_type=jnp.float32) + bias1_ref[...]
    h = jnp.maximum(_layer_norm(h, g1, be1), 0.0)      # (pt, H/2)

    # ---- layer 2: split matmul; agent-constant half folded into bias2 ----
    h = jnp.dot(h.astype(mxu_dtype), w2a_ref[...].astype(mxu_dtype),
                preferred_element_type=jnp.float32) + bias2_ref[...]
    h = jnp.maximum(_layer_norm(h, g2, be2), 0.0)      # (pt, H)

    out_ref[...] = h.astype(out_ref.dtype)


def point_subgraph(hidden_states, agent, params, *, mxu_dtype=jnp.float32):
    """PointSubGraph forward.  hidden_states: (A, P, 2), agent: (A, AH) -> (A, P, H)."""
    A, P, C = hidden_states.shape
    assert C == 2
    H = params["w2"].shape[1]
    H2 = H // 2

    # -------- hoisted agent decoder: batched over all agents (tiny) --------
    t = agent @ params["wm"] + params["bm"]
    t = jnp.maximum(_layer_norm(t, params["gm"], params["betam"]), 0.0)
    dec = jnp.concatenate([agent, t], axis=-1) @ params["wfc"] + params["bfc"]
    ag_half = dec[:, :H2]                                               # (A, H2)

    # -------- fold the agent-constant half of layers 1 and 2 into biases ----
    w1a, w1b = params["w1"][:H2], params["w1"][H2:]
    w2a, w2b = params["w2"][:H2], params["w2"][H2:]
    bias1 = (params["b1"] + ag_half @ w1b)[:, None, :]                  # (A, 1, H2)
    bias2 = (params["b2"] + ag_half @ w2b)[:, None, :]                  # (A, 1, H)

    # -------- pack the small (1, H*) vector params into two stacked arrays --
    stk2 = jnp.concatenate([params["w0"], params["b0"], params["g0"],
                            params["be0"], params["g1"], params["be1"]], axis=0)  # (7, H2)
    stkh = jnp.concatenate([params["g2"], params["be2"]], axis=0)                 # (2, H)

    # -------- point tiling (never straddles an agent boundary) --------------
    pt = P if P <= _MAX_POINT_BLOCK else _MAX_POINT_BLOCK
    P_pad = pl.cdiv(P, pt) * pt
    x = hidden_states
    if P_pad != P:   # only for P > _MAX_POINT_BLOCK and ragged
        x = jnp.pad(x, ((0, 0), (0, P_pad - P), (0, 0)))

    grid = (A, P_pad // pt)

    in_specs = [
        pl.BlockSpec((None, pt, C), lambda a, p: (a, p, 0)),     # coords
        pl.BlockSpec((None, 1, H2), lambda a, p: (a, 0, 0)),     # folded bias, layer 1
        pl.BlockSpec((None, 1, H), lambda a, p: (a, 0, 0)),      # folded bias, layer 2
        pl.BlockSpec((7, H2), lambda a, p: (0, 0)),              # stacked H/2 params
        pl.BlockSpec((H2, H2), lambda a, p: (0, 0)),             # w1 (lower half)
        pl.BlockSpec((H2, H), lambda a, p: (0, 0)),              # w2 (lower half)
        pl.BlockSpec((2, H), lambda a, p: (0, 0)),               # stacked H params
    ]

    out = pl.pallas_call(
        functools.partial(_point_tile_kernel, mxu_dtype=mxu_dtype),
        out_shape=jax.ShapeDtypeStruct((A, P_pad, H), jnp.float32),
        grid=grid,
        in_specs=in_specs,
        out_specs=pl.BlockSpec((None, pt, H), lambda a, p: (a, p, 0)),
        compiler_params=pltpu.CompilerParams(
            dimension_semantics=("parallel", "parallel")),
    )(x, bias1, bias2, stk2, w1a, w2a, stkh)

    return out[:, :P, :]


def init_params(key, hidden_size, agent_hidden_size):
    H, AH = hidden_size, agent_hidden_size
    H2 = H // 2
    keys = jax.random.split(key, 5)

    def lin(k, fan_in, fan_out):
        # PyTorch nn.Linear default init: U(-1/sqrt(fan_in), 1/sqrt(fan_in))
        kw, kb = jax.random.split(k)
        bound = 1.0 / (fan_in ** 0.5)
        w = jax.random.uniform(kw, (fan_in, fan_out), jnp.float32, -bound, bound)
        b = jax.random.uniform(kb, (1, fan_out), jnp.float32, -bound, bound)
        return w, b

    wm, bm = lin(keys[0], AH, AH)          # DecoderResCat.mlp.linear
    wfc, bfc = lin(keys[1], 2 * AH, H)     # DecoderResCat.fc
    w0, b0 = lin(keys[2], 2, H2)           # layers[0]
    w1, b1 = lin(keys[3], H, H2)           # layers[1]
    w2, b2 = lin(keys[4], H, H)            # layers[2]

    ones = lambda n: jnp.ones((1, n), jnp.float32)
    zeros = lambda n: jnp.zeros((1, n), jnp.float32)
    return dict(
        wm=wm, bm=bm, gm=ones(AH), betam=zeros(AH), wfc=wfc, bfc=bfc,
        w0=w0, b0=b0, g0=ones(H2), be0=zeros(H2),
        w1=w1, b1=b1, g1=ones(H2), be1=zeros(H2),
        w2=w2, b2=b2, g2=ones(H), be2=zeros(H),
    )


def reference(hidden_states, agent, params):
    """Pure-JAX reference mirroring the PyTorch forward (concat form)."""
    def ln(x, g, b):
        u = x.mean(-1, keepdims=True)
        s = ((x - u) ** 2).mean(-1, keepdims=True)
        return g * (x - u) / jnp.sqrt(s + LN_EPS) + b

    def mlp(x, w, bias, g, beta):
        return jnp.maximum(ln(x @ w + bias, g, beta), 0.0)

    A, P, _ = hidden_states.shape
    H = params["w2"].shape[1]
    H2 = H // 2

    t = mlp(agent, params["wm"], params["bm"], params["gm"], params["betam"])
    dec = jnp.concatenate([agent, t], -1) @ params["wfc"] + params["bfc"]
    ag = jnp.broadcast_to(dec[:, None, :H2], (A, P, H2))

    h = mlp(hidden_states, params["w0"], params["b0"], params["g0"], params["be0"])
    h = mlp(jnp.concatenate([h, ag], -1), params["w1"], params["b1"], params["g1"], params["be1"])
    h = mlp(jnp.concatenate([h, ag], -1), params["w2"], params["b2"], params["g2"], params["be2"])
    return h


if __name__ == "__main__":
    A, P = 2, 8            # predict_agent_num, point_num
    H, AH = 32, 32         # hidden_size, agent_hidden_size

    key = jax.random.PRNGKey(0)
    k_hs, k_ag, k_par = jax.random.split(key, 3)
    hidden_states = jax.random.normal(k_hs, (A, P, 2), jnp.float32)
    agent = jax.random.normal(k_ag, (A, AH), jnp.float32)
    params = init_params(k_par, H, AH)

    out = point_subgraph(hidden_states, agent, params)     # f32 MXU for tight check
    out = jax.block_until_ready(out)

    ref = jax.block_until_ready(reference(hidden_states, agent, params))
    assert out.shape == (A, P, H)
    assert jnp.allclose(out, ref, rtol=1e-3, atol=1e-3), "mismatch vs reference"

    print("KERNEL_OK")
</pallas_src>

<mosaic_0001>
module attributes {stable_mosaic.version = 11 : i64} {
  func.func @_point_tile_kernel(%arg0: i32, %arg1: i32, %arg2: memref<1x8x2xf32, #tpu.memory_space<vmem>>, %arg3: memref<1x1x16xf32, #tpu.memory_space<vmem>>, %arg4: memref<1x1x32xf32, #tpu.memory_space<vmem>>, %arg5: memref<7x16xf32, #tpu.memory_space<vmem>>, %arg6: memref<16x16xf32, #tpu.memory_space<vmem>>, %arg7: memref<16x32xf32, #tpu.memory_space<vmem>>, %arg8: memref<2x32xf32, #tpu.memory_space<vmem>>, %arg9: memref<1x8x32xf32, #tpu.memory_space<vmem>>) attributes {dimension_semantics = [#tpu.dimension_semantics<parallel>, #tpu.dimension_semantics<parallel>], iteration_bounds = array<i64: 2, 1>, scalar_prefetch = 0 : i64, scratch_operands = 0 : i64, tpu.core_type = #tpu.core_type<tc>, window_params = [{transform_indices = @transform_0, window_bounds = array<i64: 1, 8, 2>}, {transform_indices = @transform_1, window_bounds = array<i64: 1, 1, 16>}, {transform_indices = @transform_2, window_bounds = array<i64: 1, 1, 32>}, {pipeline_mode = #tpu.pipeline_mode<synchronous>, transform_indices = @transform_3, window_bounds = array<i64: 7, 16>}, {pipeline_mode = #tpu.pipeline_mode<synchronous>, transform_indices = @transform_4, window_bounds = array<i64: 16, 16>}, {pipeline_mode = #tpu.pipeline_mode<synchronous>, transform_indices = @transform_5, window_bounds = array<i64: 16, 32>}, {pipeline_mode = #tpu.pipeline_mode<synchronous>, transform_indices = @transform_6, window_bounds = array<i64: 2, 32>}, {transform_indices = @transform_7, window_bounds = array<i64: 1, 8, 32>}]} {
    %c0 = arith.constant 0 : index
    %c0_0 = arith.constant 0 : index
    %0 = vector.load %arg5[%c0, %c0_0] : memref<7x16xf32, #tpu.memory_space<vmem>>, vector<7x16xf32>
    %1 = vector.extract_strided_slice %0 {offsets = [0, 0], sizes = [1, 16], strides = [1, 1]} : vector<7x16xf32> to vector<1x16xf32>
    %2 = vector.extract_strided_slice %0 {offsets = [1, 0], sizes = [1, 16], strides = [1, 1]} : vector<7x16xf32> to vector<1x16xf32>
    %3 = vector.extract_strided_slice %0 {offsets = [2, 0], sizes = [1, 16], strides = [1, 1]} : vector<7x16xf32> to vector<1x16xf32>
    %4 = vector.extract_strided_slice %0 {offsets = [3, 0], sizes = [1, 16], strides = [1, 1]} : vector<7x16xf32> to vector<1x16xf32>
    %5 = vector.extract_strided_slice %0 {offsets = [4, 0], sizes = [1, 16], strides = [1, 1]} : vector<7x16xf32> to vector<1x16xf32>
    %6 = vector.extract_strided_slice %0 {offsets = [5, 0], sizes = [1, 16], strides = [1, 1]} : vector<7x16xf32> to vector<1x16xf32>
    %7 = vector.extract_strided_slice %0 {offsets = [6, 0], sizes = [1, 16], strides = [1, 1]} : vector<7x16xf32> to vector<1x16xf32>
    %c0_1 = arith.constant 0 : index
    %c0_2 = arith.constant 0 : index
    %8 = vector.load %arg8[%c0_1, %c0_2] : memref<2x32xf32, #tpu.memory_space<vmem>>, vector<2x32xf32>
    %9 = vector.extract_strided_slice %8 {offsets = [0, 0], sizes = [1, 32], strides = [1, 1]} : vector<2x32xf32> to vector<1x32xf32>
    %10 = vector.extract_strided_slice %8 {offsets = [1, 0], sizes = [1, 32], strides = [1, 1]} : vector<2x32xf32> to vector<1x32xf32>
    %c0_3 = arith.constant 0 : index
    %c0_4 = arith.constant 0 : index
    %c0_5 = arith.constant 0 : index
    %11 = vector.load %arg2[%c0_3, %c0_4, %c0_5] : memref<1x8x2xf32, #tpu.memory_space<vmem>>, vector<1x8x2xf32>
    %12 = vector.shape_cast %11 : vector<1x8x2xf32> to vector<8x2xf32>
    %13 = vector.extract_strided_slice %12 {offsets = [0, 0], sizes = [8, 1], strides = [1, 1]} : vector<8x2xf32> to vector<8x1xf32>
    %14 = vector.broadcast %13 : vector<8x1xf32> to vector<8x16xf32>
    %15 = vector.broadcast %1 : vector<1x16xf32> to vector<8x16xf32>
    %16 = arith.mulf %14, %15 : vector<8x16xf32>
    %17 = vector.extract_strided_slice %12 {offsets = [0, 1], sizes = [8, 1], strides = [1, 1]} : vector<8x2xf32> to vector<8x1xf32>
    %18 = vector.broadcast %17 : vector<8x1xf32> to vector<8x16xf32>
    %19 = vector.broadcast %2 : vector<1x16xf32> to vector<8x16xf32>
    %20 = arith.mulf %18, %19 : vector<8x16xf32>
    %21 = arith.addf %16, %20 : vector<8x16xf32>
    %22 = vector.broadcast %3 : vector<1x16xf32> to vector<8x16xf32>
    %23 = arith.addf %21, %22 : vector<8x16xf32>
    %cst = arith.constant dense<0.000000e+00> : vector<8xf32>
    %24 = vector.multi_reduction <add>, %23, %cst [1] : vector<8x16xf32> to vector<8xf32>
    %25 = vector.shape_cast %24 : vector<8xf32> to vector<8x1xf32>
    %cst_6 = arith.constant 1.600000e+01 : f32
    %26 = vector.broadcast %cst_6 : f32 to vector<8x1xf32>
    %27 = arith.divf %25, %26 : vector<8x1xf32>
    %28 = vector.broadcast %27 : vector<8x1xf32> to vector<8x16xf32>
    %29 = arith.subf %23, %28 : vector<8x16xf32>
    %30 = arith.mulf %29, %29 : vector<8x16xf32>
    %cst_7 = arith.constant dense<0.000000e+00> : vector<8xf32>
    %31 = vector.multi_reduction <add>, %30, %cst_7 [1] : vector<8x16xf32> to vector<8xf32>
    %32 = vector.shape_cast %31 : vector<8xf32> to vector<8x1xf32>
    %cst_8 = arith.constant 1.600000e+01 : f32
    %33 = vector.broadcast %cst_8 : f32 to vector<8x1xf32>
    %34 = arith.divf %32, %33 : vector<8x1xf32>
    %cst_9 = arith.constant 9.99999974E-6 : f32
    %35 = vector.broadcast %cst_9 : f32 to vector<8x1xf32>
    %36 = arith.addf %34, %35 : vector<8x1xf32>
    %37 = math.rsqrt %36 : vector<8x1xf32>
    %38 = vector.broadcast %37 : vector<8x1xf32> to vector<8x16xf32>
    %39 = arith.mulf %29, %38 : vector<8x16xf32>
    %40 = vector.broadcast %4 : vector<1x16xf32> to vector<8x16xf32>
    %41 = arith.mulf %40, %39 : vector<8x16xf32>
    %42 = vector.broadcast %5 : vector<1x16xf32> to vector<8x16xf32>
    %43 = arith.addf %41, %42 : vector<8x16xf32>
    %cst_10 = arith.constant 0.000000e+00 : f32
    %44 = vector.broadcast %cst_10 : f32 to vector<8x16xf32>
    %45 = arith.maximumf %43, %44 : vector<8x16xf32>
    %c0_11 = arith.constant 0 : index
    %c0_12 = arith.constant 0 : index
    %46 = vector.load %arg6[%c0_11, %c0_12] : memref<16x16xf32, #tpu.memory_space<vmem>>, vector<16x16xf32>
    %cst_13 = arith.constant dense<0.000000e+00> : vector<8x16xf32>
    %47 = tpu.matmul %45, %46, %cst_13 {dimension_numbers = #tpu.dot_dimension_numbers<[1], [0], [0], [1], [0, 0, 1, 1], [], []>} : vector<8x16xf32>, vector<16x16xf32>, vector<8x16xf32> -> vector<8x16xf32>
    %c0_14 = arith.constant 0 : index
    %c0_15 = arith.constant 0 : index
    %c0_16 = arith.constant 0 : index
    %48 = vector.load %arg3[%c0_14, %c0_15, %c0_16] : memref<1x1x16xf32, #tpu.memory_space<vmem>>, vector<1x1x16xf32>
    %49 = vector.shape_cast %48 : vector<1x1x16xf32> to vector<1x16xf32>
    %50 = vector.broadcast %49 : vector<1x16xf32> to vector<8x16xf32>
    %51 = arith.addf %47, %50 : vector<8x16xf32>
    %cst_17 = arith.constant dense<0.000000e+00> : vector<8xf32>
    %52 = vector.multi_reduction <add>, %51, %cst_17 [1] : vector<8x16xf32> to vector<8xf32>
    %53 = vector.shape_cast %52 : vector<8xf32> to vector<8x1xf32>
    %cst_18 = arith.constant 1.600000e+01 : f32
    %54 = vector.broadcast %cst_18 : f32 to vector<8x1xf32>
    %55 = arith.divf %53, %54 : vector<8x1xf32>
    %56 = vector.broadcast %55 : vector<8x1xf32> to vector<8x16xf32>
    %57 = arith.subf %51, %56 : vector<8x16xf32>
    %58 = arith.mulf %57, %57 : vector<8x16xf32>
    %cst_19 = arith.constant dense<0.000000e+00> : vector<8xf32>
    %59 = vector.multi_reduction <add>, %58, %cst_19 [1] : vector<8x16xf32> to vector<8xf32>
    %60 = vector.shape_cast %59 : vector<8xf32> to vector<8x1xf32>
    %cst_20 = arith.constant 1.600000e+01 : f32
    %61 = vector.broadcast %cst_20 : f32 to vector<8x1xf32>
    %62 = arith.divf %60, %61 : vector<8x1xf32>
    %cst_21 = arith.constant 9.99999974E-6 : f32
    %63 = vector.broadcast %cst_21 : f32 to vector<8x1xf32>
    %64 = arith.addf %62, %63 : vector<8x1xf32>
    %65 = math.rsqrt %64 : vector<8x1xf32>
    %66 = vector.broadcast %65 : vector<8x1xf32> to vector<8x16xf32>
    %67 = arith.mulf %57, %66 : vector<8x16xf32>
    %68 = vector.broadcast %6 : vector<1x16xf32> to vector<8x16xf32>
    %69 = arith.mulf %68, %67 : vector<8x16xf32>
    %70 = vector.broadcast %7 : vector<1x16xf32> to vector<8x16xf32>
    %71 = arith.addf %69, %70 : vector<8x16xf32>
    %cst_22 = arith.constant 0.000000e+00 : f32
    %72 = vector.broadcast %cst_22 : f32 to vector<8x16xf32>
    %73 = arith.maximumf %71, %72 : vector<8x16xf32>
    %c0_23 = arith.constant 0 : index
    %c0_24 = arith.constant 0 : index
    %74 = vector.load %arg7[%c0_23, %c0_24] : memref<16x32xf32, #tpu.memory_space<vmem>>, vector<16x32xf32>
    %cst_25 = arith.constant dense<0.000000e+00> : vector<8x32xf32>
    %75 = tpu.matmul %73, %74, %cst_25 {dimension_numbers = #tpu.dot_dimension_numbers<[1], [0], [0], [1], [0, 0, 1, 1], [], []>} : vector<8x16xf32>, vector<16x32xf32>, vector<8x32xf32> -> vector<8x32xf32>
    %c0_26 = arith.constant 0 : index
    %c0_27 = arith.constant 0 : index
    %c0_28 = arith.constant 0 : index
    %76 = vector.load %arg4[%c0_26, %c0_27, %c0_28] : memref<1x1x32xf32, #tpu.memory_space<vmem>>, vector<1x1x32xf32>
    %77 = vector.shape_cast %76 : vector<1x1x32xf32> to vector<1x32xf32>
    %78 = vector.broadcast %77 : vector<1x32xf32> to vector<8x32xf32>
    %79 = arith.addf %75, %78 : vector<8x32xf32>
    %cst_29 = arith.constant dense<0.000000e+00> : vector<8xf32>
    %80 = vector.multi_reduction <add>, %79, %cst_29 [1] : vector<8x32xf32> to vector<8xf32>
    %81 = vector.shape_cast %80 : vector<8xf32> to vector<8x1xf32>
    %cst_30 = arith.constant 3.200000e+01 : f32
    %82 = vector.broadcast %cst_30 : f32 to vector<8x1xf32>
    %83 = arith.divf %81, %82 : vector<8x1xf32>
    %84 = vector.broadcast %83 : vector<8x1xf32> to vector<8x32xf32>
    %85 = arith.subf %79, %84 : vector<8x32xf32>
    %86 = arith.mulf %85, %85 : vector<8x32xf32>
    %cst_31 = arith.constant dense<0.000000e+00> : vector<8xf32>
    %87 = vector.multi_reduction <add>, %86, %cst_31 [1] : vector<8x32xf32> to vector<8xf32>
    %88 = vector.shape_cast %87 : vector<8xf32> to vector<8x1xf32>
    %cst_32 = arith.constant 3.200000e+01 : f32
    %89 = vector.broadcast %cst_32 : f32 to vector<8x1xf32>
    %90 = arith.divf %88, %89 : vector<8x1xf32>
    %cst_33 = arith.constant 9.99999974E-6 : f32
    %91 = vector.broadcast %cst_33 : f32 to vector<8x1xf32>
    %92 = arith.addf %90, %91 : vector<8x1xf32>
    %93 = math.rsqrt %92 : vector<8x1xf32>
    %94 = vector.broadcast %93 : vector<8x1xf32> to vector<8x32xf32>
    %95 = arith.mulf %85, %94 : vector<8x32xf32>
    %96 = vector.broadcast %9 : vector<1x32xf32> to vector<8x32xf32>
    %97 = arith.mulf %96, %95 : vector<8x32xf32>
    %98 = vector.broadcast %10 : vector<1x32xf32> to vector<8x32xf32>
    %99 = arith.addf %97, %98 : vector<8x32xf32>
    %cst_34 = arith.constant 0.000000e+00 : f32
    %100 = vector.broadcast %cst_34 : f32 to vector<8x32xf32>
    %101 = arith.maximumf %99, %100 : vector<8x32xf32>
    %c0_35 = arith.constant 0 : index
    %c0_36 = arith.constant 0 : index
    %c0_37 = arith.constant 0 : index
    %102 = vector.load %arg9[%c0_35, %c0_36, %c0_37] : memref<1x8x32xf32, #tpu.memory_space<vmem>>, vector<1x8x32xf32>
    %103 = vector.shape_cast %102 : vector<1x8x32xf32> to vector<8x32xf32>
    %104 = vector.shape_cast %101 : vector<8x32xf32> to vector<1x8x32xf32>
    tpu.vector_store %arg9[%c0_35, %c0_36, %c0_37], %104 {strides = array<i32>} : memref<1x8x32xf32, #tpu.memory_space<vmem>>, vector<1x8x32xf32>,
    return
  }
  func.func @transform_0(%arg0: i32, %arg1: i32) -> (i32, i32, i32) {
    %c0_i32 = arith.constant 0 : i32
    %c0_i32_0 = arith.constant 0 : i32
    return %arg0, %arg1, %c0_i32 : i32, i32, i32
  }
  func.func @transform_1(%arg0: i32, %arg1: i32) -> (i32, i32, i32) {
    %c0_i32 = arith.constant 0 : i32
    %c0_i32_0 = arith.constant 0 : i32
    %c0_i32_1 = arith.constant 0 : i32
    return %arg0, %c0_i32, %c0_i32_0 : i32, i32, i32
  }
  func.func @transform_2(%arg0: i32, %arg1: i32) -> (i32, i32, i32) {
    %c0_i32 = arith.constant 0 : i32
    %c0_i32_0 = arith.constant 0 : i32
    %c0_i32_1 = arith.constant 0 : i32
    return %arg0, %c0_i32, %c0_i32_0 : i32, i32, i32
  }
  func.func @transform_3(%arg0: i32, %arg1: i32) -> (i32, i32) {
    %c0_i32 = arith.constant 0 : i32
    %c0_i32_0 = arith.constant 0 : i32
    %c0_i32_1 = arith.constant 0 : i32
    return %c0_i32, %c0_i32_0 : i32, i32
  }
  func.func @transform_4(%arg0: i32, %arg1: i32) -> (i32, i32) {
    %c0_i32 = arith.constant 0 : i32
    %c0_i32_0 = arith.constant 0 : i32
    %c0_i32_1 = arith.constant 0 : i32
    return %c0_i32, %c0_i32_0 : i32, i32
  }
  func.func @transform_5(%arg0: i32, %arg1: i32) -> (i32, i32) {
    %c0_i32 = arith.constant 0 : i32
    %c0_i32_0 = arith.constant 0 : i32
    %c0_i32_1 = arith.constant 0 : i32
    return %c0_i32, %c0_i32_0 : i32, i32
  }
  func.func @transform_6(%arg0: i32, %arg1: i32) -> (i32, i32) {
    %c0_i32 = arith.constant 0 : i32
    %c0_i32_0 = arith.constant 0 : i32
    %c0_i32_1 = arith.constant 0 : i32
    return %c0_i32, %c0_i32_0 : i32, i32
  }
  func.func @transform_7(%arg0: i32, %arg1: i32) -> (i32, i32, i32) {
    %c0_i32 = arith.constant 0 : i32
    %c0_i32_0 = arith.constant 0 : i32
    return %arg0, %arg1, %c0_i32 : i32, i32, i32
  }
}

</mosaic_0001>

<bundles_post_ra>
// kernel: tpu_custom_call.1
= control target key start
LH: loop header
LB: loop body
LE: loop exit
PB: predicated region body
PF: predicated region fallthrough
CT: control target
= control target key end

     0   :  { %12 = vsyncpa [#allocation3], 0  ;;  %s1134_s0 = inlined_call_operand.vmem [shape: f32[2,8,2], index: 0, kind: input, shape index: {}]   ;;  %s1135_s1 = inlined_call_operand.vmem [shape: f32[2,1,16], index: 1, kind: input, shape index: {}]   ;;  %s1136_s2 = inlined_call_operand.vmem [shape: f32[2,1,32], index: 2, kind: input, shape index: {}]   ;;  %s1137_s3 = inlined_call_operand.hbm [shape: f32[7,16], index: 3, kind: input, shape index: {}]   ;;  %s1138_s4 = inlined_call_operand.vmem [shape: f32[16,16], index: 4, kind: input, shape index: {}]   ;;  %s1139_s5 = inlined_call_operand.hbm [shape: f32[16,32], index: 5, kind: input, shape index: {}]   ;;  %s1140_s6 = inlined_call_operand.vmem [shape: f32[2,32], index: 6, kind: input, shape index: {}]   ;;  %s1141_s7 = inlined_call_operand.hbm [shape: f32[2,8,32], index: 7, kind: output, shape index: {}]  }
   0x1   :  { %13 = vsyncpa [#allocation6], 0 }
   0x2   :  { %14 = vsyncpa [#allocation4], 0 }
   0x3   :  { %16 = vsyncpa [#allocation4 + $0x1], 0  ;;  %s971_s24 = smov 0   ;;  %s973_s25 = smov 0  }
   0x4   :  { %s975_s26 = smov 0   ;;  %s977_s27 = smov 0  }
   0x5   :  { %s979_s28 = smov 0   ;;  %s981_s29 = smov 0  }
   0x6 LB: > { %s662_s30 = sadd.s32 4294967295, %s921_s29   ;;  %s663_s8 = sadd.s32 4294967294, %s921_s29   ;;  %s921_s29 = sphi %s981_s29, %s22_s29   ;;  %s917_s28 = sphi %s979_s28, %s1150_s28   ;;  %s913_s27 = sphi %s977_s27, %s1149_s27   ;;  %s909_s26 = sphi %s975_s26, %s1148_s26   ;;  %s905_s25 = sphi %s973_s25, %s1147_s25   ;;  %s901_s24 = sphi %s971_s24, %s1146_s24  }
   0x7   : > { %s34_s9 = sadd.s32 1, %s917_s28  ;;  %s207_s10 = sadd.s32 1, %s909_s26 }
   0x8   : > { %p36_p0 = scmp.ge.s32.totalorder %s34_s9, 2  ;;  %p217_p1 = scmp.ne.s32.totalorder %s909_s26, %s905_s25 }
   0x9   : > { %p218_p2 = scmp.eq.s32.totalorder %s662_s30, 1  ;;  %p223_p3 = scmp.ne.s32.totalorder %s905_s25, %s901_s24 }
   0xa   : > { %s1152_s9 = smov (%p36_p0, %s34_s9), 0  ;;  %p224_p5 = scmp.eq.s32.totalorder %s663_s8, 1 }
   0xb   : > { %p1011_p4 = por %p218_p2, %p217_p1  ;;  %s202_s12 = ssub.s32 %s917_s28, %s1152_s9 }
   0xc   : > { %p664_p6 = scmp.ge.s32.totalorder %s921_s29, 1  ;;  %p205_p7 = scmp.eq.s32.totalorder %s202_s12, 0 }
   0xd   : > { %p1018_p8 = por %p224_p5, %p223_p3  ;;  %p231_p9 = scmp.lt.s32.totalorder %s921_s29, 3 }
   0xe   : > { %s1024_s14 = scalar_select %p205_p7, %s909_s26, %s207_s10  }
   0xf   : > { %p1026_p10 = pnand %p664_p6, %p231_p9  ;;  %p1030_p11 = scmp.eq.s32.totalorder %s662_s30, 0 }
  0x10   : > { %s243_s19 = sshll.u32 %s1137_s3, 4  ;;  %s923_s20 = smov [#allocation2]   ;;  %s244_s19 = int_to_ptr.hbm [resolvable:$true] %s243_s19 }
  0x11   : > { %p689_p12 = pneg %p1026_p10  ;;  %s245_s21 = sshll.u32 %s923_s20, 4  ;;  %s246_s21 = int_to_ptr.vmem [resolvable:$true] %s245_s21 }
  0x12   : > { %s257_s8 = sshll.u32 %s1139_s5, 4  ;;  %s924_s30 = smov [#allocation5]   ;;  %s258_s8 = int_to_ptr.hbm [resolvable:$true] %s257_s8 }
  0x13   : > { %p690_p13 = pnand %p1030_p11, %p689_p12  ;;  %s259_s10 = sshll.u32 %s924_s30, 4  ;;  %s260_s10 = int_to_ptr.vmem [resolvable:$true] %s259_s10 }
  0x14   : > { %s925_s12 = smov 128   ;;  %s926_s17 = smov 8  }
  0x15   : > { %692 = dma.hbm_to_vmem [thread:$0]  (!%p690_p13), %s244_s19, 128, %s246_s21, [#allocation3]  }
  0x16   : > { %695 = dma.hbm_to_vmem [thread:$0]  (!%p690_p13), %s258_s8, 256, %s260_s10, [#allocation6], %s925_s12, %s925_s12, %s926_s17  }
  0x17   : > { %300 = sbr.rel (%p1026_p10) target bundleno = 1237 (0x4d5), region = 48 }
  0x1c   : > { %888 = dma.done.wait (%p1030_p11), [#allocation3], 128  }
  0x1d   : > { %890 = vsyncadd (%p1030_p11), [#allocation3], 4294967168 }
  0x1e   : > { %892 = dma.done.wait (%p1030_p11), [#allocation6], 256  }
  0x1f   : > { %894 = vsyncadd (%p1030_p11), [#allocation6], 4294967040  ;;  %p346_p0 = scmp.lt.s32.totalorder %s913_s27, 1  ;;  %v927_v0 = vmov 0   ;;  %v928_v2 = vmov 1   ;;  %vm378_vm0 = vcmask 130048  }
  0x20   : > { %761 = vset.pattern.permute.xlu0 %v927_v0  ;;  %v1062_v4 = vld [vmem:[#allocation2] sm:$0x7f]  ;;  %v929_v14 = vmov 16.0   ;;  %v414_v26 = vld [vmem:[%s1138_s4 + $0x8] sm:$0xff]  ;;  %v470_v53 = vld [vmem:[#allocation5 + $0x8] sm:$0xff]  ;;  %vm498_vm8 = vcmask 261120  }
  0x21   : > { %s1056_s18 = scalar_select %p346_p0, %s913_s27, 1  ;;  %v367_v5 = vperm.slane %v1062_v4, 0  ;;  %v373_v6 = vperm.slane %v1062_v4, 1  ;;  %v376_v10 = vperm.slane %v1062_v4, 2  ;;  %765 = vrcp.f32 %v929_v14  ;;  %v413_v27 = vld [vmem:[%s1138_s4] sm:$0xff]  ;;  %436 = vmatpush.msra.mxu0 %v414_v26  ;;  %v469_v54 = vld [vmem:[#allocation5] sm:$0xff]  ;;  %492 = vmatpush.msra.mxu1 %v470_v53 }
  0x22   : > { %v408_v37 = vperm.slane %v1062_v4, 3  ;;  %v410_v40 = vperm.slane %v1062_v4, 4  ;;  %v464_v0 = vperm.slane %v1062_v4, 5  ;;  %s676_s22 = sshll.u32 %s913_s27, 3 }
  0x23   : > { %s672_s15 = sshll.u32 %s1056_s18, 3  ;;  %s355_s23 = scalar_lea.vmem %s1135_s1, %s1056_s18  ;;  %437 = vmatpush.msra.mxu0 %v413_v27  ;;  %493 = vmatpush.msra.mxu1 %v469_v54 }
  0x24   : > { %s352_s21 = scalar_lea.vmem %s1134_s0, %s672_s15  ;;  %v763_v44 = vld [vmem:[%s355_s23] ss:$0 sm:$0xff]  ;;  %s358_s19 = scalar_lea.vmem %s1136_s2, %s1056_s18 }
  0x25   : > { %v361_v1 = vld [vmem:[%s352_s21] sm:$0xff]  ;;  %s343_s18 = sand.u32 1, %s905_s25   ;;  %s546_s30 = scalar_lea.hbm %s1141_s7, %s676_s22 }
  0x26   : > { %364 = vperm.xlu0 %761, %v361_v1   ;;  %s671_s16 = sshll.u32 %s343_s18, 3  ;;  %s550_s17 = sshll.u32 %s546_s30, 4  ;;  %s551_s17 = int_to_ptr.hbm [resolvable:$true] %s550_s17 }
  0x27   : > { %v766_v15 = vpop.eup %765  ;;  %s345_s10 = scalar_lea.vmem [#allocation7], %s671_s16  ;;  %s535_s27 = scalar_lea.sflag [#allocation4], %s343_s18 }
  0x28   : > { %v383_v16 = vmul.f32 16.0, %v766_v15  ;;  %vm387_vm1 = vweird.f32 %v766_v15  ;;  %s548_s12 = sshll.u32 %s345_s10, 4  ;;  %s849_s15 = sshra.s32 %s551_s17, 4  ;;  %s549_s12 = int_to_ptr.vmem [resolvable:$true] %s548_s12  ;;  %s850_s15 = int_to_ptr.hbm [resolvable:$true] %s849_s15 }
  0x29   : > { %s855_s16 = scalar_lea.hbm %s1141_s7, 16  ;;  %p856_p5 = scmp.lt.s32.totalorder %s850_s15, %s1141_s7 }
  0x2a   : > { %v384_v17 = vsub.f32 1.0, %v383_v16 }
  0x2c   : > { %v385_v18 = vmul.f32 %v766_v15, %v384_v17 }
  0x2e   : > { %762 = vset.pattern.permute.xlu0 %v928_v2  ;;  %v386_v19 = vadd.f32 %v766_v15, %v385_v18 }
  0x2f   : > { %370 = vperm.xlu0 %762, %v361_v1  }
  0x30   : > { %v388_v20 = vsel %vm387_vm1, %v766_v15, %v386_v19 }
  0x98   : > { %v365_v3 = vpop.permute.xlu0 %364 }
  0x99   : > { %v368_v8 = vmul.f32 %v367_v5, %v365_v3  ;;  %v466_v3 = vperm.slane %v1062_v4, 6 }
  0xa1   : > { %v371_v7 = vpop.permute.xlu0 %370 }
  0xa2   : > { %v374_v9 = vmul.f32 %v373_v6, %v371_v7 }
  0xa4   : > { %v375_v11 = vadd.f32 %v374_v9, %v368_v8  ;;  %v764_v8 = vld [vmem:[%s358_s19] ss:$0 sm:$0xff]  ;;  %s851_s19 = scalar_lea.hbm %s850_s15, 8 }
  0xa5   : > { %p852_p1 = scmp.ne.s32.totalorder %s850_s15, %s851_s19  ;;  %p857_p6 = scmp.lt.s32.totalorder %s855_s16, %s851_s19 }
  0xa6   : > { %v377_v12 = vadd.f32 %v376_v10, %v375_v11 }
  0xa7   : > { %p853_p2 = pnand %p852_p1, %p1011_p4  ;;  %p858_p7 = por %p857_p6, %p856_p5 }
  0xa8   : > { %v379_v13 = vsel %vm378_vm0, %v377_v12, 0.0 }
  0xa9   : > { %380 = vadd.xlane.f32.xlu1 %v379_v13  ;;  %p854_p3 = pneg %p853_p2 }
  0xab   : > { %p859_p9 = pnand %p858_p7, %p854_p3 }
 0x11c   : > { %v381_v21 = vpop.xlane.xlu1 %380 }
 0x11d   : > { %v389_v22 = vmul.f32 %v388_v20, %v381_v21 }
 0x11f   : > { %v390_v23 = vsub.f32 %v377_v12, %v389_v22  ;;  %v930_v12 = vmov 32.0  }
 0x121   : > { %v391_v24 = vmul.f32 %v390_v23, %v390_v23 }
 0x123   : > { %v392_v25 = vsel %vm378_vm0, %v391_v24, 0.0 }
 0x124   : > { %393 = vadd.xlane.f32.xlu1 %v392_v25 }
 0x197   : > { %v394_v28 = vpop.xlane.xlu1 %393 }
 0x198   : > { %v395_v29 = vmul.f32 %v394_v28, %v388_v20 }
 0x19a   : > { %v396_v30 = vadd.f32 1e-05, %v395_v29 }
 0x19c   : > { %767 = vrsqrt.f32 %v396_v30  ;;  %vm403_vm3 = vweird.f32 %v396_v30 }
 0x1a2   : > { %v768_v31 = vpop.eup %767 }
 0x1a3   : > { %v398_v32 = vmul.f32 %v768_v31, %v396_v30  ;;  %vm404_vm2 = vweird.f32 %v768_v31  ;;  %v360_v30 = vld [vmem:[%s1140_s6] sm:$0x3] }
 0x1a4   : > { %vm405_vm4 = vmor %vm403_vm3, %vm404_vm2 }
 0x1a5   : > { %v399_v33 = vmul.f32 %v768_v31, %v398_v32 }
 0x1a7   : > { %v400_v34 = vmul.f32 0.5, %v399_v33  ;;  %v528_v33 = vperm.slane %v360_v30, 0 }
 0x1a9   : > { %v401_v35 = vsub.f32 1.5, %v400_v34 }
 0x1ab   : > { %v402_v36 = vmul.f32 %v768_v31, %v401_v35  ;;  %v530_v35 = vperm.slane %v360_v30, 1 }
 0x1ad   : > { %v406_v38 = vsel %vm405_vm4, %v768_v31, %v402_v36 }
 0x1ae   : > { %v407_v39 = vmul.f32 %v406_v38, %v390_v23 }
 0x1b0   : > { %v409_v41 = vmul.f32 %v408_v37, %v407_v39 }
 0x1b2   : > { %v411_v42 = vadd.f32 %v410_v40, %v409_v41 }
 0x1b4   : > { %v412_v43 = vmax.f32 %v411_v42, 0.0 }
 0x1b6   : > { %673 = vmatmul.msk.f32.vlgmr.msra.gmra.mxu0 %vm378_vm0, %v412_v43 }
 0x233   : > { %v439_v45 = vpop.f32.mrf.mxu0 }
 0x234   : > { %v440_v46 = vadd.f32 %v763_v44, %v439_v45 }
 0x236   : > { %v442_v47 = vsel %vm378_vm0, %v440_v46, 0.0 }
 0x237   : > { %443 = vadd.xlane.f32.xlu2 %v442_v47 }
 0x2aa   : > { %v444_v48 = vpop.xlane.xlu2 %443 }
 0x2ab   : > { %v445_v49 = vmul.f32 %v444_v48, %v388_v20 }
 0x2ad   : > { %v446_v50 = vsub.f32 %v440_v46, %v445_v49 }
 0x2af   : > { %v447_v51 = vmul.f32 %v446_v50, %v446_v50 }
 0x2b1   : > { %v448_v52 = vsel %vm378_vm0, %v447_v51, 0.0 }
 0x2b2   : > { %449 = vadd.xlane.f32.xlu2 %v448_v52 }
 0x325   : > { %v450_v55 = vpop.xlane.xlu2 %449 }
 0x326   : > { %v451_v56 = vmul.f32 %v450_v55, %v388_v20 }
 0x328   : > { %v452_v57 = vadd.f32 1e-05, %v451_v56 }
 0x32a   : > { %769 = vrsqrt.f32 %v452_v57  ;;  %vm459_vm6 = vweird.f32 %v452_v57 }
 0x32b   : > { %771 = vrcp.f32 %v930_v12 }
 0x330   : > { %v770_v58 = vpop.eup %769 }
 0x331   : > { %v454_v59 = vmul.f32 %v770_v58, %v452_v57  ;;  %vm460_vm5 = vweird.f32 %v770_v58  ;;  %v772_v13 = vpop.eup %771 }
 0x332   : > { %vm461_vm7 = vmor %vm459_vm6, %vm460_vm5  ;;  %v503_v14 = vmul.f32 32.0, %v772_v13  ;;  %vm507_vm9 = vweird.f32 %v772_v13 }
 0x333   : > { %v455_v60 = vmul.f32 %v770_v58, %v454_v59 }
 0x334   : > { %v504_v15 = vsub.f32 1.0, %v503_v14 }
 0x335   : > { %v456_v61 = vmul.f32 0.5, %v455_v60 }
 0x336   : > { %v505_v16 = vmul.f32 %v772_v13, %v504_v15 }
 0x337   : > { %v457_v62 = vsub.f32 1.5, %v456_v61 }
 0x338   : > { %v506_v17 = vadd.f32 %v772_v13, %v505_v16 }
 0x339   : > { %v458_v63 = vmul.f32 %v770_v58, %v457_v62 }
 0x33a   : > { %v508_v4 = vsel %vm507_vm9, %v772_v13, %v506_v17 }
 0x33b   : > { %v462_v1 = vsel %vm461_vm7, %v770_v58, %v458_v63 }
 0x33c   : > { %v463_v2 = vmul.f32 %v462_v1, %v446_v50 }
 0x33e   : > { %v465_v5 = vmul.f32 %v464_v0, %v463_v2 }
 0x340   : > { %v467_v6 = vadd.f32 %v466_v3, %v465_v5 }
 0x342   : > { %v468_v7 = vmax.f32 %v467_v6, 0.0 }
 0x344   : > { %674 = vmatmul.msk.f32.vlgmr.msra.gmra.mxu1 %vm378_vm0, %v468_v7 }
 0x3c1   : > { %v495_v9 = vpop.f32.mrf.mxu1 }
 0x3c2   : > { %v496_v10 = vadd.f32 %v764_v8, %v495_v9 }
 0x3c4   : > { %v499_v11 = vsel %vm498_vm8, %v496_v10, 0.0 }
 0x3c5   : > { %500 = vadd.xlane.f32.xlu1 %v499_v11 }
 0x438   : > { %v501_v18 = vpop.xlane.xlu1 %500 }
 0x439   : > { %v509_v19 = vmul.f32 %v508_v4, %v501_v18 }
 0x43b   : > { %v510_v20 = vsub.f32 %v496_v10, %v509_v19 }
 0x43d   : > { %v511_v21 = vmul.f32 %v510_v20, %v510_v20 }
 0x43f   : > { %v512_v22 = vsel %vm498_vm8, %v511_v21, 0.0 }
 0x440   : > { %513 = vadd.xlane.f32.xlu2 %v512_v22 }
 0x4b3   : > { %v514_v23 = vpop.xlane.xlu2 %513 }
 0x4b4   : > { %v515_v24 = vmul.f32 %v514_v23, %v508_v4 }
 0x4b6   : > { %v516_v25 = vadd.f32 1e-05, %v515_v24 }
 0x4b8   : > { %773 = vrsqrt.f32 %v516_v25  ;;  %vm523_vm11 = vweird.f32 %v516_v25 }
 0x4be   : > { %v774_v26 = vpop.eup %773 }
 0x4bf   : > { %v518_v27 = vmul.f32 %v774_v26, %v516_v25  ;;  %vm524_vm10 = vweird.f32 %v774_v26 }
 0x4c0   : > { %vm525_vm12 = vmor %vm523_vm11, %vm524_vm10 }
 0x4c1   : > { %v519_v28 = vmul.f32 %v774_v26, %v518_v27 }
 0x4c3   : > { %v520_v29 = vmul.f32 0.5, %v519_v28 }
 0x4c5   : > { %v521_v31 = vsub.f32 1.5, %v520_v29 }
 0x4c7   : > { %v522_v32 = vmul.f32 %v774_v26, %v521_v31 }
 0x4c9   : > { %v526_v34 = vsel %vm525_vm12, %v774_v26, %v522_v32 }
 0x4ca   : > { %v527_v36 = vmul.f32 %v526_v34, %v510_v20 }
 0x4cc   : > { %v529_v37 = vmul.f32 %v528_v33, %v527_v36 }
 0x4ce   : > { %v531_v38 = vadd.f32 %v530_v35, %v529_v37 }
 0x4d0   : > { %v532_v39 = vmax.f32 %v531_v38, 0.0 }
 0x4d2   : > { %533 = vst.msk [vmem:[%s345_s10] sm:$0xff] %vm498_vm8, %v532_v39 }
 0x4d3   : > { %862 = shalt.err (!%p859_p9)
}
 0x4d4   : > { %687 = dma.vmem_to_hbm [thread:$0]  (%p1011_p4), %s549_s12, 128, %s551_s17, %s535_s27  }
 0x4d5 PF: > { %p704_p10 = scmp.ge.s32.totalorder %s921_s29, 2  ;;  %s562_s18 = sand.u32 1, %s901_s24  }
 0x4d6   : > { %s563_s8 = scalar_lea.sflag [#allocation4], %s562_s18 }
 0x4d7   : > { %p697_p11 = pnand %p704_p10, %p1018_p8 }
 0x4d9   : > { %p698_p12 = pneg %p697_p11 }
 0x4db   : > { %896 = dma.done.wait (%p698_p12), %s563_s8, 128  }
 0x4dc   : > { %898 = vsyncadd (%p698_p12), %s563_s8, 4294967168  ;;  %s22_s29 = sadd.s32 1, %s921_s29   ;;  %s1146_s24 = smov %s905_s25 }
 0x4dd   : > { %p19_p13 = scmp.ge.s32.totalorder %s22_s29, 4   ;;  %s1147_s25 = smov %s909_s26 }
 0x4de   : > { %s1148_s26 = smov %s1024_s14  ;;  %s1149_s27 = smov %s917_s28 }
 0x4df   : > { %s1150_s28 = smov %s1152_s9  ;;  %21 = sbr.rel (!%p19_p13) target bundleno = 6 (0x6), region = 98 }
 0x4e4   :  { %569 = vsyncpa [#allocation3], 1 }
 0x4e5   :  { %571 = vsyncpa [#allocation3 + $0x1], 1 }
 0x4e6   :  { %572 = vsyncpa [#allocation6], 1 }
 0x4e7   :  { %573 = vsyncpa [#allocation4], 1 }
 0x4e8   :  { %575 = vsyncpa [#allocation4 + $0x1], 1 }

</bundles_post_ra>
